<compile_context>
chip_gen: v6e
topology: v6e:2x2x1
jax: 0.10.0
libtpu: 0.0.40
codegen_flags: <defaults>
</compile_context>

<pallas_src>
import jax
import jax.numpy as jnp
from jax import lax
from jax.experimental import pallas as pl
from jax.experimental.pallas import tpu as pltpu

LN_EPS = 1e-5  # PyTorch nn.LayerNorm default eps

_HAS_BUFFERED = hasattr(pl, "Buffered")


def _round_up(x, m):
    return (x + m - 1) // m * m


def _vmem_capacity_bytes():
    """Per-core VMEM capacity; conservative fallback (v7x: 64 MiB/TC)."""
    try:
        cap = getattr(pltpu.get_tpu_info(), "vmem_capacity_bytes", None)
        if cap:
            return int(cap)
    except Exception:
        pass
    return 64 * 2**20


def _pipeline_vmem_bytes(tm, hidden, x_bytes, out_bytes, w_bytes, const_bufs):
    """VMEM footprint: double-buffered token tiles, const blocks, f32 temps."""
    io = 2 * tm * hidden * (x_bytes + out_bytes)        # double-buffered in/out tiles
    consts = const_bufs * (hidden * hidden * w_bytes    # projection weight
                           + 8 * hidden * 4)            # packed LN/bias vectors (f32)
    body = 4 * tm * hidden * 4                          # live f32 kernel intermediates
    return io + consts + body


def _base_expert_kernel(x_ref, pv_ref, w_ref, o_ref):
    # x_ref : (TM, H) tile of tokens.
    # pv_ref: (8, H) packed params: [ln_in_gamma, ln_in_beta, proj_bias,
    #                                ln_out_gamma, ln_out_beta, 0, 0, 0].
    # w_ref : (H, H) projection weight, [in, out] layout (bf16 or f32).
    pv = pv_ref[...].astype(jnp.float32)
    g1 = pv[0:1, :]
    b1 = pv[1:2, :]
    bw = pv[2:3, :]
    g2 = pv[3:4, :]
    b2 = pv[4:5, :]

    # ---- input LayerNorm (two-pass variance for stability) -----------------
    x = x_ref[...].astype(jnp.float32)
    mu = jnp.mean(x, axis=-1, keepdims=True)
    xc = x - mu
    var = jnp.mean(xc * xc, axis=-1, keepdims=True)
    h = xc * lax.rsqrt(var + LN_EPS) * g1 + b1
    # x / xc are dead here; the residual re-reads x_ref at the end so the f32
    # copy does not stay live across the matmul.

    # ---- expert-specific forward: abstract in PyTorch -> identity ----------
    # TODO(synk): _expert_forward / _build_expert_layers are abstract; the
    # minimal concrete expert used here is the identity.
    # ---- dropout (eval mode) = identity -------------------------------------

    # ---- output projection (nn.Linear hidden -> hidden), MXU in w's dtype ---
    p = jnp.dot(h.astype(w_ref.dtype), w_ref[...],
                preferred_element_type=jnp.float32) + bw

    # ---- output LayerNorm ----------------------------------------------------
    mu2 = jnp.mean(p, axis=-1, keepdims=True)
    pc = p - mu2
    var2 = jnp.mean(pc * pc, axis=-1, keepdims=True)
    y = pc * lax.rsqrt(var2 + LN_EPS) * g2 + b2

    # ---- residual add (re-read x tile; valid for partial last block too) ----
    o_ref[...] = (y + x_ref[...].astype(jnp.float32)).astype(o_ref.dtype)


def prepare_expert_params(params, matmul_dtype=jnp.bfloat16):
    """One-time parameter packing/casting (do NOT call per forward step).

    Packs the five (H,) vectors into one aligned (8, H) f32 block (single DMA)
    and casts the projection weight to the MXU dtype once.
    """
    H = params["proj_weight_io"].shape[0]
    zeros = jnp.zeros((H,), jnp.float32)
    pv = jnp.stack([
        params["ln_in_gamma"].astype(jnp.float32),
        params["ln_in_beta"].astype(jnp.float32),
        params["proj_bias"].astype(jnp.float32),
        params["ln_out_gamma"].astype(jnp.float32),
        params["ln_out_beta"].astype(jnp.float32),
        zeros, zeros, zeros,
    ], axis=0)
    w = params["proj_weight_io"].astype(matmul_dtype)   # [in, out]
    return {"pv": pv, "w": w}


def _const_spec(block_shape, index_map, single_buffer):
    """BlockSpec for a grid-invariant operand; single-buffer when supported."""
    if single_buffer and _HAS_BUFFERED:
        try:
            return pl.BlockSpec(block_shape, index_map,
                                pipeline_mode=pl.Buffered(1))
        except TypeError:
            pass
    return pl.BlockSpec(block_shape, index_map)


def base_expert_forward(hidden_states, prepared_params, *, tm=512,
                        vmem_budget_bytes=None):
    """hidden_states: [N, H]; prepared_params: output of prepare_expert_params.

    Output dtype matches hidden_states dtype; internal math is f32 with the
    MXU fed the prepared weight's dtype (bf16 by default).
    """
    N, H = hidden_states.shape
    pv = prepared_params["pv"]
    w = prepared_params["w"]
    out_dtype = hidden_states.dtype
    x_bytes = jnp.dtype(hidden_states.dtype).itemsize
    w_bytes = jnp.dtype(w.dtype).itemsize
    # Native sublane packing of the I/O dtype: 8 (f32), 16 (bf16), 32 (int8).
    sublane = max(8, 32 // x_bytes)

    vmem_cap = _vmem_capacity_bytes()
    if vmem_budget_bytes is None:
        budget = max(16 * 2**20, int(0.45 * vmem_cap))
    else:
        budget = int(vmem_budget_bytes)

    def run(single_buffer):
        const_bufs = 1 if single_buffer else 2

        # Clamp the token tile to the (sublane-rounded) token count, then
        # shrink until the pipeline fits the generation-aware VMEM budget.
        tm_eff = min(_round_up(tm, sublane), _round_up(N, sublane))
        while tm_eff > sublane and _pipeline_vmem_bytes(
                tm_eff, H, x_bytes, x_bytes, w_bytes, const_bufs) > budget:
            tm_eff = max(sublane, _round_up(tm_eff // 2, sublane))

        needed = _pipeline_vmem_bytes(tm_eff, H, x_bytes, x_bytes, w_bytes,
                                      const_bufs)
        vmem_limit = int(min(vmem_cap, max(needed + 8 * 2**20, 16 * 2**20)))

        row_spec = pl.BlockSpec((tm_eff, H), lambda i: (i, 0))
        pv_spec = _const_spec((8, H), lambda i: (0, 0), single_buffer)
        mat_spec = _const_spec((H, H), lambda i: (0, 0), single_buffer)

        return pl.pallas_call(
            _base_expert_kernel,
            out_shape=jax.ShapeDtypeStruct((N, H), out_dtype),
            grid_spec=pltpu.PrefetchScalarGridSpec(
                num_scalar_prefetch=0,
                grid=(pl.cdiv(N, tm_eff),),   # partial last block masked by Pallas
                in_specs=[row_spec, pv_spec, mat_spec],
                out_specs=row_spec,
            ),
            compiler_params=pltpu.CompilerParams(
                dimension_semantics=("parallel",),
                vmem_limit_bytes=vmem_limit),
        )(hidden_states, pv, w)

    if _HAS_BUFFERED:
        try:
            return run(True)
        except Exception:
            # pipeline_mode=Buffered(1) rejected by this JAX/Mosaic build (or
            # silently ignored and the tighter VMEM limit tripped): retry with
            # default double-buffering and matching VMEM accounting.
            pass
    return run(False)


def _reference_forward(x, params):
    g1, b1 = params["ln_in_gamma"], params["ln_in_beta"]
    g2, b2 = params["ln_out_gamma"], params["ln_out_beta"]
    w, bw = params["proj_weight_io"], params["proj_bias"]

    def ln(v, g, b):
        mu = jnp.mean(v, -1, keepdims=True)
        var = jnp.mean((v - mu) ** 2, -1, keepdims=True)
        return (v - mu) * lax.rsqrt(var + LN_EPS) * g + b

    h = ln(x, g1, b1)          # input_norm
    p = h @ w + bw             # output_projection (expert fwd = identity)
    return ln(p, g2, b2) + x   # output_norm + residual


if __name__ == "__main__":
    batch, seq, hidden = 2, 8, 128
    N = batch * seq

    key = jax.random.PRNGKey(0)
    kx, kw, kb = jax.random.split(key, 3)

    x = jax.random.normal(kx, (N, hidden), dtype=jnp.float32)

    # Deterministic parameter init (LayerNorm: gamma=1, beta=0;
    # Linear: small random weights, as nn.Linear would have).
    bound = 1.0 / (hidden ** 0.5)
    params = {
        "ln_in_gamma": jnp.ones((hidden,), jnp.float32),
        "ln_in_beta": jnp.zeros((hidden,), jnp.float32),
        "proj_weight_io": jax.random.uniform(
            kw, (hidden, hidden), jnp.float32, -bound, bound),
        "proj_bias": jax.random.uniform(
            kb, (hidden,), jnp.float32, -bound, bound),
        "ln_out_gamma": jnp.ones((hidden,), jnp.float32),
        "ln_out_beta": jnp.zeros((hidden,), jnp.float32),
    }

    ref = _reference_forward(x, params)

    # Pack/cast parameters ONCE (per review: no per-call weight cast).
    prep_f32 = prepare_expert_params(params, matmul_dtype=jnp.float32)
    prep_bf16 = prepare_expert_params(params, matmul_dtype=jnp.bfloat16)

    # 1) Exact path: f32 MXU operands, tight tolerance vs. f32 reference.
    out_f32 = jax.block_until_ready(base_expert_forward(x, prep_f32))
    assert out_f32.shape == (N, hidden)
    assert jnp.allclose(out_f32, ref, atol=1e-4, rtol=1e-4), "f32 path mismatch"

    # 2) Performance path: bf16 MXU operands (weight stored bf16 in HBM).
    out_bf16mm = jax.block_until_ready(base_expert_forward(x, prep_bf16))
    assert jnp.allclose(out_bf16mm, ref, atol=5e-2, rtol=5e-2), \
        "bf16-matmul path mismatch"

    # 3) bf16 I/O path (half the HBM traffic); compute stays f32 in-kernel.
    out_bf16io = jax.block_until_ready(
        base_expert_forward(x.astype(jnp.bfloat16), prep_bf16))
    assert out_bf16io.dtype == jnp.bfloat16
    assert jnp.allclose(out_bf16io.astype(jnp.float32), ref,
                        atol=1e-1, rtol=1e-1), "bf16 I/O path mismatch"

    # 4) Ragged token count (partial last block, no wrapper pad/slice).
    out_rag = jax.block_until_ready(base_expert_forward(x[:13], prep_f32))
    assert out_rag.shape == (13, hidden)
    assert jnp.allclose(out_rag, ref[:13], atol=1e-4, rtol=1e-4), \
        "ragged-N path mismatch"

    print("KERNEL_OK")
</pallas_src>

<mosaic_0001>
module attributes {stable_mosaic.version = 11 : i64} {
  func.func @_base_expert_kernel(%arg0: i32, %arg1: memref<16x128xf32, #tpu.memory_space<vmem>>, %arg2: memref<8x128xf32, #tpu.memory_space<vmem>>, %arg3: memref<128x128xf32, #tpu.memory_space<vmem>>, %arg4: memref<16x128xf32, #tpu.memory_space<vmem>>) attributes {dimension_semantics = [#tpu.dimension_semantics<parallel>], iteration_bounds = array<i64: 1>, scalar_prefetch = 0 : i64, scratch_operands = 0 : i64, tpu.core_type = #tpu.core_type<tc>, window_params = [{transform_indices = @transform_0, window_bounds = array<i64: 16, 128>}, {pipeline_mode = #tpu.pipeline_mode<synchronous>, transform_indices = @transform_1, window_bounds = array<i64: 8, 128>}, {pipeline_mode = #tpu.pipeline_mode<synchronous>, transform_indices = @transform_2, window_bounds = array<i64: 128, 128>}, {transform_indices = @transform_3, window_bounds = array<i64: 16, 128>}]} {
    %c0 = arith.constant 0 : index
    %c0_0 = arith.constant 0 : index
    %0 = vector.load %arg2[%c0, %c0_0] : memref<8x128xf32, #tpu.memory_space<vmem>>, vector<8x128xf32>
    %1 = vector.extract_strided_slice %0 {offsets = [0, 0], sizes = [1, 128], strides = [1, 1]} : vector<8x128xf32> to vector<1x128xf32>
    %2 = vector.extract_strided_slice %0 {offsets = [1, 0], sizes = [1, 128], strides = [1, 1]} : vector<8x128xf32> to vector<1x128xf32>
    %3 = vector.extract_strided_slice %0 {offsets = [2, 0], sizes = [1, 128], strides = [1, 1]} : vector<8x128xf32> to vector<1x128xf32>
    %4 = vector.extract_strided_slice %0 {offsets = [3, 0], sizes = [1, 128], strides = [1, 1]} : vector<8x128xf32> to vector<1x128xf32>
    %5 = vector.extract_strided_slice %0 {offsets = [4, 0], sizes = [1, 128], strides = [1, 1]} : vector<8x128xf32> to vector<1x128xf32>
    %c0_1 = arith.constant 0 : index
    %c0_2 = arith.constant 0 : index
    %6 = vector.load %arg1[%c0_1, %c0_2] : memref<16x128xf32, #tpu.memory_space<vmem>>, vector<16x128xf32>
    %cst = arith.constant dense<0.000000e+00> : vector<16xf32>
    %7 = vector.multi_reduction <add>, %6, %cst [1] : vector<16x128xf32> to vector<16xf32>
    %8 = vector.shape_cast %7 : vector<16xf32> to vector<16x1xf32>
    %cst_3 = arith.constant 1.280000e+02 : f32
    %9 = vector.broadcast %cst_3 : f32 to vector<16x1xf32>
    %10 = arith.divf %8, %9 : vector<16x1xf32>
    %11 = vector.broadcast %10 : vector<16x1xf32> to vector<16x128xf32>
    %12 = arith.subf %6, %11 : vector<16x128xf32>
    %13 = arith.mulf %12, %12 : vector<16x128xf32>
    %cst_4 = arith.constant dense<0.000000e+00> : vector<16xf32>
    %14 = vector.multi_reduction <add>, %13, %cst_4 [1] : vector<16x128xf32> to vector<16xf32>
    %15 = vector.shape_cast %14 : vector<16xf32> to vector<16x1xf32>
    %cst_5 = arith.constant 1.280000e+02 : f32
    %16 = vector.broadcast %cst_5 : f32 to vector<16x1xf32>
    %17 = arith.divf %15, %16 : vector<16x1xf32>
    %cst_6 = arith.constant 9.99999974E-6 : f32
    %18 = vector.broadcast %cst_6 : f32 to vector<16x1xf32>
    %19 = arith.addf %17, %18 : vector<16x1xf32>
    %20 = math.rsqrt %19 : vector<16x1xf32>
    %21 = vector.broadcast %20 : vector<16x1xf32> to vector<16x128xf32>
    %22 = arith.mulf %12, %21 : vector<16x128xf32>
    %23 = vector.broadcast %1 : vector<1x128xf32> to vector<16x128xf32>
    %24 = arith.mulf %22, %23 : vector<16x128xf32>
    %25 = vector.broadcast %2 : vector<1x128xf32> to vector<16x128xf32>
    %26 = arith.addf %24, %25 : vector<16x128xf32>
    %c0_7 = arith.constant 0 : index
    %c0_8 = arith.constant 0 : index
    %27 = vector.load %arg3[%c0_7, %c0_8] : memref<128x128xf32, #tpu.memory_space<vmem>>, vector<128x128xf32>
    %cst_9 = arith.constant dense<0.000000e+00> : vector<16x128xf32>
    %28 = tpu.matmul %26, %27, %cst_9 {dimension_numbers = #tpu.dot_dimension_numbers<[1], [0], [0], [1], [0, 0, 1, 1], [], []>} : vector<16x128xf32>, vector<128x128xf32>, vector<16x128xf32> -> vector<16x128xf32>
    %29 = vector.broadcast %3 : vector<1x128xf32> to vector<16x128xf32>
    %30 = arith.addf %28, %29 : vector<16x128xf32>
    %cst_10 = arith.constant dense<0.000000e+00> : vector<16xf32>
    %31 = vector.multi_reduction <add>, %30, %cst_10 [1] : vector<16x128xf32> to vector<16xf32>
    %32 = vector.shape_cast %31 : vector<16xf32> to vector<16x1xf32>
    %cst_11 = arith.constant 1.280000e+02 : f32
    %33 = vector.broadcast %cst_11 : f32 to vector<16x1xf32>
    %34 = arith.divf %32, %33 : vector<16x1xf32>
    %35 = vector.broadcast %34 : vector<16x1xf32> to vector<16x128xf32>
    %36 = arith.subf %30, %35 : vector<16x128xf32>
    %37 = arith.mulf %36, %36 : vector<16x128xf32>
    %cst_12 = arith.constant dense<0.000000e+00> : vector<16xf32>
    %38 = vector.multi_reduction <add>, %37, %cst_12 [1] : vector<16x128xf32> to vector<16xf32>
    %39 = vector.shape_cast %38 : vector<16xf32> to vector<16x1xf32>
    %cst_13 = arith.constant 1.280000e+02 : f32
    %40 = vector.broadcast %cst_13 : f32 to vector<16x1xf32>
    %41 = arith.divf %39, %40 : vector<16x1xf32>
    %cst_14 = arith.constant 9.99999974E-6 : f32
    %42 = vector.broadcast %cst_14 : f32 to vector<16x1xf32>
    %43 = arith.addf %41, %42 : vector<16x1xf32>
    %44 = math.rsqrt %43 : vector<16x1xf32>
    %45 = vector.broadcast %44 : vector<16x1xf32> to vector<16x128xf32>
    %46 = arith.mulf %36, %45 : vector<16x128xf32>
    %47 = vector.broadcast %4 : vector<1x128xf32> to vector<16x128xf32>
    %48 = arith.mulf %46, %47 : vector<16x128xf32>
    %49 = vector.broadcast %5 : vector<1x128xf32> to vector<16x128xf32>
    %50 = arith.addf %48, %49 : vector<16x128xf32>
    %c0_15 = arith.constant 0 : index
    %c0_16 = arith.constant 0 : index
    %51 = vector.load %arg1[%c0_15, %c0_16] : memref<16x128xf32, #tpu.memory_space<vmem>>, vector<16x128xf32>
    %52 = arith.addf %50, %51 : vector<16x128xf32>
    %c0_17 = arith.constant 0 : index
    %c0_18 = arith.constant 0 : index
    %53 = vector.load %arg4[%c0_17, %c0_18] : memref<16x128xf32, #tpu.memory_space<vmem>>, vector<16x128xf32>
    tpu.vector_store %arg4[%c0_17, %c0_18], %52 {strides = array<i32>} : memref<16x128xf32, #tpu.memory_space<vmem>>, vector<16x128xf32>,
    return
  }
  func.func @transform_0(%arg0: i32) -> (i32, i32) {
    %c0_i32 = arith.constant 0 : i32
    %c0_i32_0 = arith.constant 0 : i32
    return %arg0, %c0_i32 : i32, i32
  }
  func.func @transform_1(%arg0: i32) -> (i32, i32) {
    %c0_i32 = arith.constant 0 : i32
    %c0_i32_0 = arith.constant 0 : i32
    %c0_i32_1 = arith.constant 0 : i32
    return %c0_i32, %c0_i32_0 : i32, i32
  }
  func.func @transform_2(%arg0: i32) -> (i32, i32) {
    %c0_i32 = arith.constant 0 : i32
    %c0_i32_0 = arith.constant 0 : i32
    %c0_i32_1 = arith.constant 0 : i32
    return %c0_i32, %c0_i32_0 : i32, i32
  }
  func.func @transform_3(%arg0: i32) -> (i32, i32) {
    %c0_i32 = arith.constant 0 : i32
    %c0_i32_0 = arith.constant 0 : i32
    return %arg0, %c0_i32 : i32, i32
  }
}

module attributes {stable_mosaic.version = 11 : i64} {
  func.func @_base_expert_kernel(%arg0: i32, %arg1: memref<16x128xf32, #tpu.memory_space<vmem>>, %arg2: memref<8x128xf32, #tpu.memory_space<vmem>>, %arg3: memref<128x128xf32, #tpu.memory_space<vmem>>, %arg4: memref<16x128xf32, #tpu.memory_space<vmem>>) attributes {dimension_semantics = [#tpu.dimension_semantics<parallel>], iteration_bounds = array<i64: 1>, scalar_prefetch = 0 : i64, scratch_operands = 0 : i64, tpu.core_type = #tpu.core_type<tc>, window_params = [{transform_indices = @transform_0, window_bounds = array<i64: 16, 128>}, {pipeline_mode = #tpu.pipeline_mode<synchronous>, transform_indices = @transform_1, window_bounds = array<i64: 8, 128>}, {pipeline_mode = #tpu.pipeline_mode<synchronous>, transform_indices = @transform_2, window_bounds = array<i64: 128, 128>}, {transform_indices = @transform_3, window_bounds = array<i64: 16, 128>}]} {
    %c0 = arith.constant 0 : index
    %c0_0 = arith.constant 0 : index
    %0 = vector.load %arg2[%c0, %c0_0] : memref<8x128xf32, #tpu.memory_space<vmem>>, vector<8x128xf32>
    %1 = vector.extract_strided_slice %0 {offsets = [0, 0], sizes = [1, 128], strides = [1, 1]} : vector<8x128xf32> to vector<1x128xf32>
    %2 = vector.extract_strided_slice %0 {offsets = [1, 0], sizes = [1, 128], strides = [1, 1]} : vector<8x128xf32> to vector<1x128xf32>
    %3 = vector.extract_strided_slice %0 {offsets = [2, 0], sizes = [1, 128], strides = [1, 1]} : vector<8x128xf32> to vector<1x128xf32>
    %4 = vector.extract_strided_slice %0 {offsets = [3, 0], sizes = [1, 128], strides = [1, 1]} : vector<8x128xf32> to vector<1x128xf32>
    %5 = vector.extract_strided_slice %0 {offsets = [4, 0], sizes = [1, 128], strides = [1, 1]} : vector<8x128xf32> to vector<1x128xf32>
    %c0_1 = arith.constant 0 : index
    %c0_2 = arith.constant 0 : index
    %6 = vector.load %arg1[%c0_1, %c0_2] : memref<16x128xf32, #tpu.memory_space<vmem>>, vector<16x128xf32>
    %cst = arith.constant dense<0.000000e+00> : vector<16xf32>
    %7 = vector.multi_reduction <add>, %6, %cst [1] : vector<16x128xf32> to vector<16xf32>
    %8 = vector.shape_cast %7 : vector<16xf32> to vector<16x1xf32>
    %cst_3 = arith.constant 1.280000e+02 : f32
    %9 = vector.broadcast %cst_3 : f32 to vector<16x1xf32>
    %10 = arith.divf %8, %9 : vector<16x1xf32>
    %11 = vector.broadcast %10 : vector<16x1xf32> to vector<16x128xf32>
    %12 = arith.subf %6, %11 : vector<16x128xf32>
    %13 = arith.mulf %12, %12 : vector<16x128xf32>
    %cst_4 = arith.constant dense<0.000000e+00> : vector<16xf32>
    %14 = vector.multi_reduction <add>, %13, %cst_4 [1] : vector<16x128xf32> to vector<16xf32>
    %15 = vector.shape_cast %14 : vector<16xf32> to vector<16x1xf32>
    %cst_5 = arith.constant 1.280000e+02 : f32
    %16 = vector.broadcast %cst_5 : f32 to vector<16x1xf32>
    %17 = arith.divf %15, %16 : vector<16x1xf32>
    %cst_6 = arith.constant 9.99999974E-6 : f32
    %18 = vector.broadcast %cst_6 : f32 to vector<16x1xf32>
    %19 = arith.addf %17, %18 : vector<16x1xf32>
    %20 = math.rsqrt %19 : vector<16x1xf32>
    %21 = vector.broadcast %20 : vector<16x1xf32> to vector<16x128xf32>
    %22 = arith.mulf %12, %21 : vector<16x128xf32>
    %23 = vector.broadcast %1 : vector<1x128xf32> to vector<16x128xf32>
    %24 = arith.mulf %22, %23 : vector<16x128xf32>
    %25 = vector.broadcast %2 : vector<1x128xf32> to vector<16x128xf32>
    %26 = arith.addf %24, %25 : vector<16x128xf32>
    %c0_7 = arith.constant 0 : index
    %c0_8 = arith.constant 0 : index
    %27 = vector.load %arg3[%c0_7, %c0_8] : memref<128x128xf32, #tpu.memory_space<vmem>>, vector<128x128xf32>
    %cst_9 = arith.constant dense<0.000000e+00> : vector<16x128xf32>
    %28 = tpu.matmul %26, %27, %cst_9 {dimension_numbers = #tpu.dot_dimension_numbers<[1], [0], [0], [1], [0, 0, 1, 1], [], []>} : vector<16x128xf32>, vector<128x128xf32>, vector<16x128xf32> -> vector<16x128xf32>
    %29 = vector.broadcast %3 : vector<1x128xf32> to vector<16x128xf32>
    %30 = arith.addf %28, %29 : vector<16x128xf32>
    %cst_10 = arith.constant dense<0.000000e+00> : vector<16xf32>
    %31 = vector.multi_reduction <add>, %30, %cst_10 [1] : vector<16x128xf32> to vector<16xf32>
    %32 = vector.shape_cast %31 : vector<16xf32> to vector<16x1xf32>
    %cst_11 = arith.constant 1.280000e+02 : f32
    %33 = vector.broadcast %cst_11 : f32 to vector<16x1xf32>
    %34 = arith.divf %32, %33 : vector<16x1xf32>
    %35 = vector.broadcast %34 : vector<16x1xf32> to vector<16x128xf32>
    %36 = arith.subf %30, %35 : vector<16x128xf32>
    %37 = arith.mulf %36, %36 : vector<16x128xf32>
    %cst_12 = arith.constant dense<0.000000e+00> : vector<16xf32>
    %38 = vector.multi_reduction <add>, %37, %cst_12 [1] : vector<16x128xf32> to vector<16xf32>
    %39 = vector.shape_cast %38 : vector<16xf32> to vector<16x1xf32>
    %cst_13 = arith.constant 1.280000e+02 : f32
    %40 = vector.broadcast %cst_13 : f32 to vector<16x1xf32>
    %41 = arith.divf %39, %40 : vector<16x1xf32>
    %cst_14 = arith.constant 9.99999974E-6 : f32
    %42 = vector.broadcast %cst_14 : f32 to vector<16x1xf32>
    %43 = arith.addf %41, %42 : vector<16x1xf32>
    %44 = math.rsqrt %43 : vector<16x1xf32>
    %45 = vector.broadcast %44 : vector<16x1xf32> to vector<16x128xf32>
    %46 = arith.mulf %36, %45 : vector<16x128xf32>
    %47 = vector.broadcast %4 : vector<1x128xf32> to vector<16x128xf32>
    %48 = arith.mulf %46, %47 : vector<16x128xf32>
    %49 = vector.broadcast %5 : vector<1x128xf32> to vector<16x128xf32>
    %50 = arith.addf %48, %49 : vector<16x128xf32>
    %c0_15 = arith.constant 0 : index
    %c0_16 = arith.constant 0 : index
    %51 = vector.load %arg1[%c0_15, %c0_16] : memref<16x128xf32, #tpu.memory_space<vmem>>, vector<16x128xf32>
    %52 = arith.addf %50, %51 : vector<16x128xf32>
    %c0_17 = arith.constant 0 : index
    %c0_18 = arith.constant 0 : index
    %53 = vector.load %arg4[%c0_17, %c0_18] : memref<16x128xf32, #tpu.memory_space<vmem>>, vector<16x128xf32>
    tpu.vector_store %arg4[%c0_17, %c0_18], %52 {strides = array<i32>} : memref<16x128xf32, #tpu.memory_space<vmem>>, vector<16x128xf32>,
    return
  }
  func.func @transform_0(%arg0: i32) -> (i32, i32) {
    %c0_i32 = arith.constant 0 : i32
    %c0_i32_0 = arith.constant 0 : i32
    return %arg0, %c0_i32 : i32, i32
  }
  func.func @transform_1(%arg0: i32) -> (i32, i32) {
    %c0_i32 = arith.constant 0 : i32
    %c0_i32_0 = arith.constant 0 : i32
    %c0_i32_1 = arith.constant 0 : i32
    return %c0_i32, %c0_i32_0 : i32, i32
  }
  func.func @transform_2(%arg0: i32) -> (i32, i32) {
    %c0_i32 = arith.constant 0 : i32
    %c0_i32_0 = arith.constant 0 : i32
    %c0_i32_1 = arith.constant 0 : i32
    return %c0_i32, %c0_i32_0 : i32, i32
  }
  func.func @transform_3(%arg0: i32) -> (i32, i32) {
    %c0_i32 = arith.constant 0 : i32
    %c0_i32_0 = arith.constant 0 : i32
    return %arg0, %c0_i32 : i32, i32
  }
}

</mosaic_0001>

<bundles_post_ra>
// kernel: tpu_custom_call.1
= control target key start
LH: loop header
LB: loop body
LE: loop exit
PB: predicated region body
PF: predicated region fallthrough
CT: control target
= control target key end

     0   :  { %8 = vsyncpa [#allocation3], 0  ;;  %s463_s0 = inlined_call_operand.hbm [shape: f32[16,128], index: 0, kind: input, shape index: {}]   ;;  %s464_s1 = inlined_call_operand.hbm [shape: f32[8,128], index: 1, kind: input, shape index: {}]   ;;  %s465_s2 = inlined_call_operand.hbm [shape: f32[128,128], index: 2, kind: input, shape index: {}]   ;;  %s466_s3 = inlined_call_operand.hbm [shape: f32[16,128], index: 3, kind: output, shape index: {}]  }
   0x1   :  { %9 = vsyncpa [#allocation6], 0 }
   0x2   :  { %10 = vsyncpa [#allocation4], 0  ;;  %s396_s12 = smov [#allocation5]   ;;  %s397_s14 = smov [#allocation2]  }
   0x3   :  { %s29_s13 = sshll.u32 %s396_s12, 4  ;;  %s16_s15 = sshll.u32 %s397_s14, 4  ;;  %s30_s13 = int_to_ptr.vmem [resolvable:$true] %s29_s13  ;;  %s17_s15 = int_to_ptr.vmem [resolvable:$true] %s16_s15 }
   0x4   :  { %s318_s16 = scalar_lea.vmem %s30_s13, 128  ;;  %p323_p1 = scmp.lt.s32.totalorder %s30_s13, %s30_s13 }
   0x5   :  { %p319_p0 = scmp.ne.s32.totalorder %s30_s13, %s318_s16  ;;  %p324_p2 = scmp.lt.s32.totalorder %s318_s16, %s318_s16 }
   0x7   :  { %p325_p3 = por %p324_p2, %p323_p1 }
   0x9   :  { %p326_p4 = pnand %p325_p3, %p319_p0 }
   0xb   :  { %329 = shalt.err (!%p326_p4)
}
   0xc   :  { %32 = dma.hbm_to_vmem [thread:$0]  %s464_s1, 128, %s30_s13, [#allocation6]  }
   0xd   :  { %s338_s19 = scalar_lea.vmem %s17_s15, 256  ;;  %p343_p6 = scmp.lt.s32.totalorder %s17_s15, %s17_s15 }
   0xe   :  { %p339_p5 = scmp.ne.s32.totalorder %s17_s15, %s338_s19  ;;  %p344_p7 = scmp.lt.s32.totalorder %s338_s19, %s338_s19 }
  0x10   :  { %p345_p8 = por %p344_p7, %p343_p6 }
  0x12   :  { %p346_p9 = pnand %p345_p8, %p339_p5 }
  0x14   :  { %349 = shalt.err (!%p346_p9)
}
  0x15   :  { %s398_s20 = smov 128   ;;  %s399_s21 = smov 8  }
  0x16   :  { %22 = dma.hbm_to_vmem [thread:$0]  %s463_s0, 256, %s17_s15, [#allocation3], %s398_s20, %s398_s20, %s399_s21  }
  0x17   :  { %s400_s24 = smov [#allocation7]  }
  0x18   :  { %s38_s25 = sshll.u32 %s400_s24, 4  ;;  %s39_s25 = int_to_ptr.vmem [resolvable:$true] %s38_s25 }
  0x19   :  { %s358_s1 = scalar_lea.vmem %s39_s25, 2048  ;;  %p363_p11 = scmp.lt.s32.totalorder %s39_s25, %s39_s25 }
  0x1a   :  { %p359_p10 = scmp.ne.s32.totalorder %s39_s25, %s358_s1  ;;  %p364_p12 = scmp.lt.s32.totalorder %s358_s1, %s358_s1 }
  0x1c   :  { %p365_p13 = por %p364_p12, %p363_p11 }
  0x1e   :  { %p366_p0 = pnand %p365_p13, %p359_p10 }
  0x20   :  { %369 = shalt.err (!%p366_p0)
}
  0x21   :  { %44 = dma.hbm_to_vmem [thread:$0]  %s465_s2, 2048, %s39_s25, [#allocation6], %s398_s20, %s398_s20, %s399_s21  }
  0x22   :  { %390 = dma.done.wait [#allocation3], 256  }
  0x23   :  { %391 = vsyncadd [#allocation3], 4294967040 }
  0x24   :  { %392 = dma.done.wait [#allocation6], 2176  }
  0x25   :  { %393 = vsyncadd [#allocation6], 4294965120  ;;  %v437_v0 = vld [vmem:[#allocation2] sm:$0xff]  ;;  %v440_v1 = vld [vmem:[#allocation2 + $0x8] sm:$0xff]  ;;  %v80_v31 = vlaneseq  ;;  %s401_s0 = smov [#allocation8]  }
  0x26   :  { %57 = vadd.xlane.f32.xlu0 %v437_v0  ;;  %v107_v2 = vld [vmem:[#allocation7 + $0x78] sm:$0xff]  ;;  %v106_v3 = vld [vmem:[#allocation7 + $0x70] sm:$0xff]  ;;  %v105_v12 = vld [vmem:[#allocation7 + $0x68] sm:$0xff]  ;;  %s230_s2 = sshll.u32 %s401_s0, 4  ;;  %s231_s2 = int_to_ptr.vmem [resolvable:$true] %s230_s2 }
  0x27   :  { %261 = vmatprep.subr.mxu0 %v107_v2  ;;  %v104_v13 = vld [vmem:[#allocation7 + $0x60] sm:$0xff]  ;;  %v103_v14 = vld [vmem:[#allocation7 + $0x58] sm:$0xff]  ;;  %v102_v15 = vld [vmem:[#allocation7 + $0x50] sm:$0xff]  ;;  %v81_v33 = vshrl.u32 %v80_v31, 7  ;;  %s370_s28 = scalar_lea.vmem %s231_s2, 256  ;;  %p375_p2 = scmp.lt.s32.totalorder %s231_s2, %s231_s2 }
  0x28   :  { %262 = vmatpush3.msra.mxu0 %v107_v2  ;;  %v101_v16 = vld [vmem:[#allocation7 + $0x48] sm:$0xff]  ;;  %v100_v17 = vld [vmem:[#allocation7 + $0x40] sm:$0xff]  ;;  %v99_v18 = vld [vmem:[#allocation7 + $0x38] sm:$0xff]  ;;  %p371_p1 = scmp.ne.s32.totalorder %s231_s2, %s370_s28  ;;  %p376_p3 = scmp.lt.s32.totalorder %s370_s28, %s370_s28 }
  0x29   :  { %263 = vmatprep.subr.mxu0 %v106_v3  ;;  %v98_v19 = vld [vmem:[#allocation7 + $0x30] sm:$0xff]  ;;  %v97_v20 = vld [vmem:[#allocation7 + $0x28] sm:$0xff]  ;;  %v96_v21 = vld [vmem:[#allocation7 + $0x20] sm:$0xff]  ;;  %v82_v34 = vsub.s32 0, %v81_v33  ;;  %v88_v36 = vsub.s32 1, %v81_v33  ;;  %v110_v47 = vsub.s32 2, %v81_v33 }
  0x2a   :  { %59 = vadd.xlane.f32.xlu0 %v440_v1  ;;  %264 = vmatpush3.msra.mxu0 %v106_v3  ;;  %v95_v22 = vld [vmem:[#allocation7 + $0x18] sm:$0xff]  ;;  %v94_v23 = vld [vmem:[#allocation7 + $0x10] sm:$0xff]  ;;  %v93_v24 = vld [vmem:[#allocation7 + $0x8] sm:$0xff]  ;;  %p377_p4 = por %p376_p3, %p375_p2 }
  0x2b   :  { %265 = vmatprep.subr.mxu0 %v105_v12  ;;  %v92_v25 = vld [vmem:[#allocation7] sm:$0xff]  ;;  %v54_v35 = vld [vmem:[#allocation5] sm:$0xff] }
  0x2c   :  { %266 = vmatpush3.msra.mxu0 %v105_v12  ;;  %v83_v37 = vrot.slane %v54_v35, %v82_v34  ;;  %v89_v40 = vrot.slane %v54_v35, %v88_v36  ;;  %v111_v48 = vrot.slane %v54_v35, %v110_v47  ;;  %p378_p5 = pnand %p377_p4, %p371_p1 }
  0x2d   :  { %267 = vmatprep.subr.mxu0 %v104_v13 }
  0x2e   :  { %268 = vmatpush3.msra.mxu0 %v104_v13 }
  0x2f   :  { %269 = vmatprep.subr.mxu0 %v103_v14 }
  0x30   :  { %270 = vmatpush3.msra.mxu0 %v103_v14 }
  0x31   :  { %271 = vmatprep.subr.mxu0 %v102_v15 }
  0x32   :  { %272 = vmatpush3.msra.mxu0 %v102_v15 }
  0x33   :  { %273 = vmatprep.subr.mxu0 %v101_v16 }
  0x34   :  { %274 = vmatpush3.msra.mxu0 %v101_v16 }
  0x35   :  { %275 = vmatprep.subr.mxu0 %v100_v17 }
  0x36   :  { %276 = vmatpush3.msra.mxu0 %v100_v17 }
  0x37   :  { %277 = vmatprep.subr.mxu0 %v99_v18 }
  0x38   :  { %278 = vmatpush3.msra.mxu0 %v99_v18 }
  0x39   :  { %279 = vmatprep.subr.mxu0 %v98_v19 }
  0x3a   :  { %280 = vmatpush3.msra.mxu0 %v98_v19 }
  0x3b   :  { %281 = vmatprep.subr.mxu0 %v97_v20 }
  0x3c   :  { %282 = vmatpush3.msra.mxu0 %v97_v20 }
  0x3d   :  { %283 = vmatprep.subr.mxu0 %v96_v21 }
  0x3e   :  { %284 = vmatpush3.msra.mxu0 %v96_v21 }
  0x3f   :  { %285 = vmatprep.subr.mxu0 %v95_v22 }
  0x40   :  { %286 = vmatpush3.msra.mxu0 %v95_v22 }
  0x41   :  { %287 = vmatprep.subr.mxu0 %v94_v23 }
  0x42   :  { %288 = vmatpush3.msra.mxu0 %v94_v23 }
  0x43   :  { %289 = vmatprep.subr.mxu0 %v93_v24 }
  0x44   :  { %290 = vmatpush3.msra.mxu0 %v93_v24 }
  0x45   :  { %291 = vmatprep.subr.mxu0 %v92_v25 }
  0x46   :  { %292 = vmatpush3.msra.mxu0 %v92_v25 }
  0xaf   :  { %v58_v4 = vpop.xlane.xlu0 %57 }
  0xb0   :  { %v62_v5 = vmul.f32 0.0078125, %v58_v4 }
  0xb2   :  { %v444_v6 = vsub.f32 %v437_v0, %v62_v5  ;;  %v211_v5 = vsub.s32 3, %v81_v33 }
  0xb3   :  { %v60_v7 = vpop.xlane.xlu0 %59 }
  0xb4   :  { %v63_v8 = vmul.f32 0.0078125, %v60_v7  ;;  %v66_v9 = vmul.f32 %v444_v6, %v444_v6  ;;  %v212_v7 = vrot.slane %v54_v35, %v211_v5 }
  0xb6   :  { %v449_v10 = vsub.f32 %v440_v1, %v63_v8  ;;  %68 = vadd.xlane.f32.xlu1 %v66_v9 }
  0xb8   :  { %v67_v11 = vmul.f32 %v449_v10, %v449_v10 }
  0xba   :  { %70 = vadd.xlane.f32.xlu1 %v67_v11 }
 0x13f   :  { %v69_v26 = vpop.xlane.xlu1 %68 }
 0x140   :  { %v72_v27 = vmul.f32 0.0078125, %v69_v26 }
 0x142   :  { %v74_v28 = vadd.f32 1e-05, %v72_v27 }
 0x143   :  { %v71_v29 = vpop.xlane.xlu1 %70 }
 0x144   :  { %302 = vrsqrt.f32 %v74_v28  ;;  %v73_v30 = vmul.f32 0.0078125, %v71_v29 }
 0x146   :  { %v75_v32 = vadd.f32 1e-05, %v73_v30 }
 0x148   :  { %304 = vrsqrt.f32 %v75_v32 }
 0x151   :  { %v303_v38 = vpop.eup %302 }
 0x152   :  { %v78_v39 = vmul.f32 %v303_v38, %v444_v6  ;;  %v217_v6 = vsub.s32 4, %v81_v33 }
 0x154   :  { %v84_v41 = vmul.f32 %v83_v37, %v78_v39 }
 0x155   :  { %v305_v42 = vpop.eup %304 }
 0x156   :  { %v90_v43 = vadd.f32 %v89_v40, %v84_v41  ;;  %v79_v44 = vmul.f32 %v305_v42, %v449_v10  ;;  %v218_v10 = vrot.slane %v54_v35, %v217_v6 }
 0x158   :  { %293 = vmatprep.mubr.f32.mxu0 %v90_v43  ;;  %v85_v45 = vmul.f32 %v83_v37, %v79_v44 }
 0x15a   :  { %v91_v46 = vadd.f32 %v89_v40, %v85_v45 }
 0x15c   :  { %294 = vmatmul.mubr.f32.vlgmr.msra.gmra.mxu0 %v91_v46 }
 0x21c   :  { %v295_v49 = vpop.f32.mrf.mxu0 }
 0x21d   :  { %v184_v50 = vadd.f32 %v295_v49, %v111_v48 }
 0x21e   :  { %v178_v51 = vpop.f32.mrf.mxu0 }
 0x21f   :  { %v179_v52 = vadd.f32 %v178_v51, %v111_v48  ;;  %189 = vadd.xlane.f32.xlu1 %v184_v50 }
 0x221   :  { %187 = vadd.xlane.f32.xlu0 %v179_v52 }
 0x2a8   :  { %v190_v53 = vpop.xlane.xlu1 %189 }
 0x2a9   :  { %v192_v54 = vmul.f32 0.0078125, %v190_v53 }
 0x2aa   :  { %v188_v55 = vpop.xlane.xlu0 %187 }
 0x2ab   :  { %v194_v56 = vsub.f32 %v184_v50, %v192_v54  ;;  %v191_v57 = vmul.f32 0.0078125, %v188_v55 }
 0x2ad   :  { %v193_v58 = vsub.f32 %v179_v52, %v191_v57  ;;  %v196_v59 = vmul.f32 %v194_v56, %v194_v56 }
 0x2af   :  { %199 = vadd.xlane.f32.xlu1 %v196_v59  ;;  %v195_v60 = vmul.f32 %v193_v58, %v193_v58 }
 0x2b1   :  { %197 = vadd.xlane.f32.xlu0 %v195_v60 }
 0x338   :  { %v200_v61 = vpop.xlane.xlu1 %199 }
 0x339   :  { %v202_v62 = vmul.f32 0.0078125, %v200_v61 }
 0x33a   :  { %v198_v63 = vpop.xlane.xlu0 %197 }
 0x33b   :  { %v204_v2 = vadd.f32 1e-05, %v202_v62  ;;  %v201_v3 = vmul.f32 0.0078125, %v198_v63 }
 0x33d   :  { %306 = vrsqrt.f32 %v204_v2  ;;  %v203_v4 = vadd.f32 1e-05, %v201_v3 }
 0x33f   :  { %308 = vrsqrt.f32 %v203_v4 }
 0x34a   :  { %v307_v8 = vpop.eup %306 }
 0x34b   :  { %v208_v9 = vmul.f32 %v307_v8, %v194_v56 }
 0x34c   :  { %v309_v11 = vpop.eup %308 }
 0x34d   :  { %v207_v12 = vmul.f32 %v309_v11, %v193_v58  ;;  %v214_v13 = vmul.f32 %v212_v7, %v208_v9 }
 0x34f   :  { %v213_v14 = vmul.f32 %v212_v7, %v207_v12  ;;  %v220_v15 = vadd.f32 %v218_v10, %v214_v13 }
 0x351   :  { %v219_v16 = vadd.f32 %v218_v10, %v213_v14  ;;  %v222_v17 = vadd.f32 %v220_v15, %v440_v1 }
 0x353   :  { %v221_v18 = vadd.f32 %v219_v16, %v437_v0  ;;  %224 = vst [vmem:[#allocation8 + $0x8] sm:$0xff] %v222_v17 }
 0x355   :  { %223 = vst [vmem:[#allocation8] sm:$0xff] %v221_v18 }
 0x356   :  { %381 = shalt.err (!%p378_p5)
}
 0x357   :  { %236 = dma.vmem_to_hbm [thread:$0]  %s231_s2, 256, %s466_s3, [#allocation4], %s398_s20, %s398_s20, %s399_s21  }
 0x358   :  { %394 = dma.done.wait [#allocation4], 256  }
 0x359   :  { %395 = vsyncadd [#allocation4], 4294967040 }
 0x35a   :  { %240 = vsyncpa [#allocation3], 1 }
 0x35b   :  { %241 = vsyncpa [#allocation6], 1 }
 0x35c   :  { %242 = vsyncpa [#allocation4], 1 }

// kernel: tpu_custom_call.1
= control target key start
LH: loop header
LB: loop body
LE: loop exit
PB: predicated region body
PF: predicated region fallthrough
CT: control target
= control target key end

     0   :  { %8 = vsyncpa [#allocation3], 0  ;;  %s463_s0 = inlined_call_operand.hbm [shape: f32[16,128], index: 0, kind: input, shape index: {}]   ;;  %s464_s1 = inlined_call_operand.hbm [shape: f32[8,128], index: 1, kind: input, shape index: {}]   ;;  %s465_s2 = inlined_call_operand.hbm [shape: f32[128,128], index: 2, kind: input, shape index: {}]   ;;  %s466_s3 = inlined_call_operand.hbm [shape: f32[16,128], index: 3, kind: output, shape index: {}]  }
   0x1   :  { %9 = vsyncpa [#allocation6], 0 }
   0x2   :  { %10 = vsyncpa [#allocation4], 0  ;;  %s396_s12 = smov [#allocation5]   ;;  %s397_s14 = smov [#allocation2]  }
   0x3   :  { %s29_s13 = sshll.u32 %s396_s12, 4  ;;  %s16_s15 = sshll.u32 %s397_s14, 4  ;;  %s30_s13 = int_to_ptr.vmem [resolvable:$true] %s29_s13  ;;  %s17_s15 = int_to_ptr.vmem [resolvable:$true] %s16_s15 }
   0x4   :  { %s318_s16 = scalar_lea.vmem %s30_s13, 128  ;;  %p323_p1 = scmp.lt.s32.totalorder %s30_s13, %s30_s13 }
   0x5   :  { %p319_p0 = scmp.ne.s32.totalorder %s30_s13, %s318_s16  ;;  %p324_p2 = scmp.lt.s32.totalorder %s318_s16, %s318_s16 }
   0x7   :  { %p325_p3 = por %p324_p2, %p323_p1 }
   0x9   :  { %p326_p4 = pnand %p325_p3, %p319_p0 }
   0xb   :  { %329 = shalt.err (!%p326_p4)
}
   0xc   :  { %32 = dma.hbm_to_vmem [thread:$0]  %s464_s1, 128, %s30_s13, [#allocation6]  }
   0xd   :  { %s338_s19 = scalar_lea.vmem %s17_s15, 256  ;;  %p343_p6 = scmp.lt.s32.totalorder %s17_s15, %s17_s15 }
   0xe   :  { %p339_p5 = scmp.ne.s32.totalorder %s17_s15, %s338_s19  ;;  %p344_p7 = scmp.lt.s32.totalorder %s338_s19, %s338_s19 }
  0x10   :  { %p345_p8 = por %p344_p7, %p343_p6 }
  0x12   :  { %p346_p9 = pnand %p345_p8, %p339_p5 }
  0x14   :  { %349 = shalt.err (!%p346_p9)
}
  0x15   :  { %s398_s20 = smov 128   ;;  %s399_s21 = smov 8  }
  0x16   :  { %22 = dma.hbm_to_vmem [thread:$0]  %s463_s0, 256, %s17_s15, [#allocation3], %s398_s20, %s398_s20, %s399_s21  }
  0x17   :  { %s400_s24 = smov [#allocation7]  }
  0x18   :  { %s38_s25 = sshll.u32 %s400_s24, 4  ;;  %s39_s25 = int_to_ptr.vmem [resolvable:$true] %s38_s25 }
  0x19   :  { %s358_s1 = scalar_lea.vmem %s39_s25, 2048  ;;  %p363_p11 = scmp.lt.s32.totalorder %s39_s25, %s39_s25 }
  0x1a   :  { %p359_p10 = scmp.ne.s32.totalorder %s39_s25, %s358_s1  ;;  %p364_p12 = scmp.lt.s32.totalorder %s358_s1, %s358_s1 }
  0x1c   :  { %p365_p13 = por %p364_p12, %p363_p11 }
  0x1e   :  { %p366_p0 = pnand %p365_p13, %p359_p10 }
  0x20   :  { %369 = shalt.err (!%p366_p0)
}
  0x21   :  { %44 = dma.hbm_to_vmem [thread:$0]  %s465_s2, 2048, %s39_s25, [#allocation6], %s398_s20, %s398_s20, %s399_s21  }
  0x22   :  { %390 = dma.done.wait [#allocation3], 256  }
  0x23   :  { %391 = vsyncadd [#allocation3], 4294967040 }
  0x24   :  { %392 = dma.done.wait [#allocation6], 2176  }
  0x25   :  { %393 = vsyncadd [#allocation6], 4294965120  ;;  %v437_v0 = vld [vmem:[#allocation2] sm:$0xff]  ;;  %v440_v1 = vld [vmem:[#allocation2 + $0x8] sm:$0xff]  ;;  %v80_v31 = vlaneseq  ;;  %s401_s0 = smov [#allocation8]  }
  0x26   :  { %57 = vadd.xlane.f32.xlu0 %v437_v0  ;;  %v107_v2 = vld [vmem:[#allocation7 + $0x78] sm:$0xff]  ;;  %v106_v3 = vld [vmem:[#allocation7 + $0x70] sm:$0xff]  ;;  %v105_v12 = vld [vmem:[#allocation7 + $0x68] sm:$0xff]  ;;  %s230_s2 = sshll.u32 %s401_s0, 4  ;;  %s231_s2 = int_to_ptr.vmem [resolvable:$true] %s230_s2 }
  0x27   :  { %261 = vmatprep.subr.mxu0 %v107_v2  ;;  %v104_v13 = vld [vmem:[#allocation7 + $0x60] sm:$0xff]  ;;  %v103_v14 = vld [vmem:[#allocation7 + $0x58] sm:$0xff]  ;;  %v102_v15 = vld [vmem:[#allocation7 + $0x50] sm:$0xff]  ;;  %v81_v33 = vshrl.u32 %v80_v31, 7  ;;  %s370_s28 = scalar_lea.vmem %s231_s2, 256  ;;  %p375_p2 = scmp.lt.s32.totalorder %s231_s2, %s231_s2 }
  0x28   :  { %262 = vmatpush3.msra.mxu0 %v107_v2  ;;  %v101_v16 = vld [vmem:[#allocation7 + $0x48] sm:$0xff]  ;;  %v100_v17 = vld [vmem:[#allocation7 + $0x40] sm:$0xff]  ;;  %v99_v18 = vld [vmem:[#allocation7 + $0x38] sm:$0xff]  ;;  %p371_p1 = scmp.ne.s32.totalorder %s231_s2, %s370_s28  ;;  %p376_p3 = scmp.lt.s32.totalorder %s370_s28, %s370_s28 }
  0x29   :  { %263 = vmatprep.subr.mxu0 %v106_v3  ;;  %v98_v19 = vld [vmem:[#allocation7 + $0x30] sm:$0xff]  ;;  %v97_v20 = vld [vmem:[#allocation7 + $0x28] sm:$0xff]  ;;  %v96_v21 = vld [vmem:[#allocation7 + $0x20] sm:$0xff]  ;;  %v82_v34 = vsub.s32 0, %v81_v33  ;;  %v88_v36 = vsub.s32 1, %v81_v33  ;;  %v110_v47 = vsub.s32 2, %v81_v33 }
  0x2a   :  { %59 = vadd.xlane.f32.xlu0 %v440_v1  ;;  %264 = vmatpush3.msra.mxu0 %v106_v3  ;;  %v95_v22 = vld [vmem:[#allocation7 + $0x18] sm:$0xff]  ;;  %v94_v23 = vld [vmem:[#allocation7 + $0x10] sm:$0xff]  ;;  %v93_v24 = vld [vmem:[#allocation7 + $0x8] sm:$0xff]  ;;  %p377_p4 = por %p376_p3, %p375_p2 }
  0x2b   :  { %265 = vmatprep.subr.mxu0 %v105_v12  ;;  %v92_v25 = vld [vmem:[#allocation7] sm:$0xff]  ;;  %v54_v35 = vld [vmem:[#allocation5] sm:$0xff] }
  0x2c   :  { %266 = vmatpush3.msra.mxu0 %v105_v12  ;;  %v83_v37 = vrot.slane %v54_v35, %v82_v34  ;;  %v89_v40 = vrot.slane %v54_v35, %v88_v36  ;;  %v111_v48 = vrot.slane %v54_v35, %v110_v47  ;;  %p378_p5 = pnand %p377_p4, %p371_p1 }
  0x2d   :  { %267 = vmatprep.subr.mxu0 %v104_v13 }
  0x2e   :  { %268 = vmatpush3.msra.mxu0 %v104_v13 }
  0x2f   :  { %269 = vmatprep.subr.mxu0 %v103_v14 }
  0x30   :  { %270 = vmatpush3.msra.mxu0 %v103_v14 }
  0x31   :  { %271 = vmatprep.subr.mxu0 %v102_v15 }
  0x32   :  { %272 = vmatpush3.msra.mxu0 %v102_v15 }
  0x33   :  { %273 = vmatprep.subr.mxu0 %v101_v16 }
  0x34   :  { %274 = vmatpush3.msra.mxu0 %v101_v16 }
  0x35   :  { %275 = vmatprep.subr.mxu0 %v100_v17 }
  0x36   :  { %276 = vmatpush3.msra.mxu0 %v100_v17 }
  0x37   :  { %277 = vmatprep.subr.mxu0 %v99_v18 }
  0x38   :  { %278 = vmatpush3.msra.mxu0 %v99_v18 }
  0x39   :  { %279 = vmatprep.subr.mxu0 %v98_v19 }
  0x3a   :  { %280 = vmatpush3.msra.mxu0 %v98_v19 }
  0x3b   :  { %281 = vmatprep.subr.mxu0 %v97_v20 }
  0x3c   :  { %282 = vmatpush3.msra.mxu0 %v97_v20 }
  0x3d   :  { %283 = vmatprep.subr.mxu0 %v96_v21 }
  0x3e   :  { %284 = vmatpush3.msra.mxu0 %v96_v21 }
  0x3f   :  { %285 = vmatprep.subr.mxu0 %v95_v22 }
  0x40   :  { %286 = vmatpush3.msra.mxu0 %v95_v22 }
  0x41   :  { %287 = vmatprep.subr.mxu0 %v94_v23 }
  0x42   :  { %288 = vmatpush3.msra.mxu0 %v94_v23 }
  0x43   :  { %289 = vmatprep.subr.mxu0 %v93_v24 }
  0x44   :  { %290 = vmatpush3.msra.mxu0 %v93_v24 }
  0x45   :  { %291 = vmatprep.subr.mxu0 %v92_v25 }
  0x46   :  { %292 = vmatpush3.msra.mxu0 %v92_v25 }
  0xaf   :  { %v58_v4 = vpop.xlane.xlu0 %57 }
  0xb0   :  { %v62_v5 = vmul.f32 0.0078125, %v58_v4 }
  0xb2   :  { %v444_v6 = vsub.f32 %v437_v0, %v62_v5  ;;  %v211_v5 = vsub.s32 3, %v81_v33 }
  0xb3   :  { %v60_v7 = vpop.xlane.xlu0 %59 }
  0xb4   :  { %v63_v8 = vmul.f32 0.0078125, %v60_v7  ;;  %v66_v9 = vmul.f32 %v444_v6, %v444_v6  ;;  %v212_v7 = vrot.slane %v54_v35, %v211_v5 }
  0xb6   :  { %v449_v10 = vsub.f32 %v440_v1, %v63_v8  ;;  %68 = vadd.xlane.f32.xlu1 %v66_v9 }
  0xb8   :  { %v67_v11 = vmul.f32 %v449_v10, %v449_v10 }
  0xba   :  { %70 = vadd.xlane.f32.xlu1 %v67_v11 }
 0x13f   :  { %v69_v26 = vpop.xlane.xlu1 %68 }
 0x140   :  { %v72_v27 = vmul.f32 0.0078125, %v69_v26 }
 0x142   :  { %v74_v28 = vadd.f32 1e-05, %v72_v27 }
 0x143   :  { %v71_v29 = vpop.xlane.xlu1 %70 }
 0x144   :  { %302 = vrsqrt.f32 %v74_v28  ;;  %v73_v30 = vmul.f32 0.0078125, %v71_v29 }
 0x146   :  { %v75_v32 = vadd.f32 1e-05, %v73_v30 }
 0x148   :  { %304 = vrsqrt.f32 %v75_v32 }
 0x151   :  { %v303_v38 = vpop.eup %302 }
 0x152   :  { %v78_v39 = vmul.f32 %v303_v38, %v444_v6  ;;  %v217_v6 = vsub.s32 4, %v81_v33 }
 0x154   :  { %v84_v41 = vmul.f32 %v83_v37, %v78_v39 }
 0x155   :  { %v305_v42 = vpop.eup %304 }
 0x156   :  { %v90_v43 = vadd.f32 %v89_v40, %v84_v41  ;;  %v79_v44 = vmul.f32 %v305_v42, %v449_v10  ;;  %v218_v10 = vrot.slane %v54_v35, %v217_v6 }
 0x158   :  { %293 = vmatprep.mubr.f32.mxu0 %v90_v43  ;;  %v85_v45 = vmul.f32 %v83_v37, %v79_v44 }
 0x15a   :  { %v91_v46 = vadd.f32 %v89_v40, %v85_v45 }
 0x15c   :  { %294 = vmatmul.mubr.f32.vlgmr.msra.gmra.mxu0 %v91_v46 }
 0x21c   :  { %v295_v49 = vpop.f32.mrf.mxu0 }
 0x21d   :  { %v184_v50 = vadd.f32 %v295_v49, %v111_v48 }
 0x21e   :  { %v178_v51 = vpop.f32.mrf.mxu0 }
 0x21f   :  { %v179_v52 = vadd.f32 %v178_v51, %v111_v48  ;;  %189 = vadd.xlane.f32.xlu1 %v184_v50 }
 0x221   :  { %187 = vadd.xlane.f32.xlu0 %v179_v52 }
 0x2a8   :  { %v190_v53 = vpop.xlane.xlu1 %189 }
 0x2a9   :  { %v192_v54 = vmul.f32 0.0078125, %v190_v53 }
 0x2aa   :  { %v188_v55 = vpop.xlane.xlu0 %187 }
 0x2ab   :  { %v194_v56 = vsub.f32 %v184_v50, %v192_v54  ;;  %v191_v57 = vmul.f32 0.0078125, %v188_v55 }
 0x2ad   :  { %v193_v58 = vsub.f32 %v179_v52, %v191_v57  ;;  %v196_v59 = vmul.f32 %v194_v56, %v194_v56 }
 0x2af   :  { %199 = vadd.xlane.f32.xlu1 %v196_v59  ;;  %v195_v60 = vmul.f32 %v193_v58, %v193_v58 }
 0x2b1   :  { %197 = vadd.xlane.f32.xlu0 %v195_v60 }
 0x338   :  { %v200_v61 = vpop.xlane.xlu1 %199 }
 0x339   :  { %v202_v62 = vmul.f32 0.0078125, %v200_v61 }
 0x33a   :  { %v198_v63 = vpop.xlane.xlu0 %197 }
 0x33b   :  { %v204_v2 = vadd.f32 1e-05, %v202_v62  ;;  %v201_v3 = vmul.f32 0.0078125, %v198_v63 }
 0x33d   :  { %306 = vrsqrt.f32 %v204_v2  ;;  %v203_v4 = vadd.f32 1e-05, %v201_v3 }
 0x33f   :  { %308 = vrsqrt.f32 %v203_v4 }
 0x34a   :  { %v307_v8 = vpop.eup %306 }
 0x34b   :  { %v208_v9 = vmul.f32 %v307_v8, %v194_v56 }
 0x34c   :  { %v309_v11 = vpop.eup %308 }
 0x34d   :  { %v207_v12 = vmul.f32 %v309_v11, %v193_v58  ;;  %v214_v13 = vmul.f32 %v212_v7, %v208_v9 }
 0x34f   :  { %v213_v14 = vmul.f32 %v212_v7, %v207_v12  ;;  %v220_v15 = vadd.f32 %v218_v10, %v214_v13 }
 0x351   :  { %v219_v16 = vadd.f32 %v218_v10, %v213_v14  ;;  %v222_v17 = vadd.f32 %v220_v15, %v440_v1 }
 0x353   :  { %v221_v18 = vadd.f32 %v219_v16, %v437_v0  ;;  %224 = vst [vmem:[#allocation8 + $0x8] sm:$0xff] %v222_v17 }
 0x355   :  { %223 = vst [vmem:[#allocation8] sm:$0xff] %v221_v18 }
 0x356   :  { %381 = shalt.err (!%p378_p5)
}
 0x357   :  { %236 = dma.vmem_to_hbm [thread:$0]  %s231_s2, 256, %s466_s3, [#allocation4], %s398_s20, %s398_s20, %s399_s21  }
 0x358   :  { %394 = dma.done.wait [#allocation4], 256  }
 0x359   :  { %395 = vsyncadd [#allocation4], 4294967040 }
 0x35a   :  { %240 = vsyncpa [#allocation3], 1 }
 0x35b   :  { %241 = vsyncpa [#allocation6], 1 }
 0x35c   :  { %242 = vsyncpa [#allocation4], 1 }

</bundles_post_ra>
